<compile_context>
chip_gen: v6e
topology: v6e:2x2x1
jax: 0.10.0
libtpu: 0.0.40
codegen_flags: <defaults>
</compile_context>

<pallas_src>
import functools

import jax
import jax.numpy as jnp
from jax.experimental import pallas as pl
from jax.experimental.pallas import tpu as pltpu


def _round_up(x: int, m: int) -> int:
    return (x + m - 1) // m * m


def confluence_kernel(x_ref, w_ref, b_ref, o_ref, acc_ref):
    k = pl.program_id(2)

    # First K step: initialize the accumulator with the broadcast bias
    # (fuses the bias add into the required accumulator init).
    @pl.when(k == 0)
    def _():
        acc_ref[...] = jnp.broadcast_to(
            b_ref[...].astype(jnp.float32), acc_ref.shape
        )

    # MXU matmul, f32 accumulation.
    acc_ref[...] += jnp.dot(
        x_ref[...], w_ref[...], preferred_element_type=jnp.float32
    )

    # Last K step: leaky-clip epilogue + store.
    @pl.when(k == pl.num_programs(2) - 1)
    def _():
        out = acc_ref[...]
        # 0.99 * clip(out, 0, 1) + 0.01 * out  ==  out - 0.99 * (out - clip(out, 0, 1))
        y = out - 0.99 * (out - jnp.clip(out, 0.0, 1.0))
        o_ref[...] = y.astype(o_ref.dtype)


# Conservative budget that fits the *default* scoped-VMEM limit on every
# generation (v5e: 16 MiB default scoped, v6e: 32 MiB, v7x: 32 MiB of 64 MiB).
_VMEM_BUDGET_BYTES = 16 * 1024 * 1024


def _working_set_bytes(tm, tn, tk, in_itemsize, out_itemsize):
    # double-buffered x tile + w tile + out tile, plus f32 accumulator scratch.
    return (
        2 * (tm * tk + tk * tn) * in_itemsize
        + 2 * tm * tn * out_itemsize
        + tm * tn * 4
    )


@functools.partial(jax.jit, static_argnames=("tm", "tn", "tk", "compute_dtype"))
def confluence_unit(x, weight, bias, *, tm=None, tn=None, tk=None,
                    compute_dtype=None):
    """x: (M, K), weight: (K, N), bias: (N,) -> (M, N).

    compute_dtype: optional dtype for the matmul inputs (e.g. jnp.bfloat16 on
    v5e/v6e for MXU/bandwidth wins); accumulation and epilogue stay f32.
    """
    M, K = x.shape
    K2, N = weight.shape
    assert K == K2, f"shape mismatch: x {x.shape} vs weight {weight.shape}"
    out_dtype = x.dtype
    if compute_dtype is None:
        compute_dtype = x.dtype

    # --- Hardware-friendly padded shapes: sublane (8) for M, lane (128) for K/N.
    Mp = _round_up(M, 8)
    Kp = _round_up(K, 128)
    Np = _round_up(N, 128)

    # --- Tile selection: memory-bound op -> big-but-bounded tiles.
    if tm is None:
        tm = min(Mp, 512)
    if tn is None:
        tn = min(Np, 512)
    if tk is None:
        tk = min(Kp, 512)
    assert tm % 8 == 0 and tn % 128 == 0 and tk % 128 == 0

    # Shrink the M tile until the double-buffered working set fits the
    # conservative VMEM budget (keeps pipelining alive on v7x's smaller VMEM).
    in_isz = jnp.dtype(compute_dtype).itemsize
    out_isz = jnp.dtype(out_dtype).itemsize
    while _working_set_bytes(tm, tn, tk, in_isz, out_isz) > _VMEM_BUDGET_BYTES and tm > 8:
        tm = max(8, tm // 2)
    assert _working_set_bytes(tm, tn, tk, in_isz, out_isz) <= _VMEM_BUDGET_BYTES, (
        "tile working set exceeds scoped-VMEM budget; reduce tn/tk")

    Mp = _round_up(Mp, tm)
    Np = _round_up(Np, tn)
    Kp = _round_up(Kp, tk)

    # --- Pad operands (zero padding is exact: extra K contributes 0 to the dot,
    # extra M/N rows/cols are sliced off below).
    x_p = x.astype(compute_dtype)
    if (Mp, Kp) != (M, K):
        x_p = jnp.pad(x_p, ((0, Mp - M), (0, Kp - K)))
    w_p = weight.astype(compute_dtype)
    if (Kp, Np) != (K, N):
        w_p = jnp.pad(w_p, ((0, Kp - K), (0, Np - N)))
    b_p = bias.astype(jnp.float32)
    if Np != N:
        b_p = jnp.pad(b_p, (0, Np - N))
    b_p = b_p.reshape(1, Np)

    grid = (Mp // tm, Np // tn, Kp // tk)

    out_p = pl.pallas_call(
        confluence_kernel,
        out_shape=jax.ShapeDtypeStruct((Mp, Np), out_dtype),
        grid_spec=pltpu.PrefetchScalarGridSpec(
            num_scalar_prefetch=0,
            grid=grid,
            in_specs=[
                pl.BlockSpec((tm, tk), lambda i, j, k: (i, k)),  # x tile
                pl.BlockSpec((tk, tn), lambda i, j, k: (k, j)),  # weight tile
                pl.BlockSpec((1, tn), lambda i, j, k: (0, j)),   # bias row tile
            ],
            out_specs=pl.BlockSpec((tm, tn), lambda i, j, k: (i, j)),
            scratch_shapes=[pltpu.VMEM((tm, tn), jnp.float32)],
        ),
        compiler_params=pltpu.CompilerParams(
            dimension_semantics=("parallel", "parallel", "arbitrary"),
        ),
    )(x_p, w_p, b_p)

    if (Mp, Np) != (M, N):
        out_p = out_p[:M, :N]
    return out_p


def init_params(key, in_features, out_features):
    """Deterministic synthetic init matching the module's __init__ semantics."""
    kw, kb = jax.random.split(key)
    # xavier_uniform_: U(-a, a), a = sqrt(6 / (fan_in + fan_out))
    a = jnp.sqrt(6.0 / (in_features + out_features))
    weight = jax.random.uniform(
        kw, (in_features, out_features), jnp.float32, minval=-a, maxval=a
    )
    # truncated_normal_(std=0.5): normal truncated to (-2, 2), scaled by 0.5
    bias = 0.5 * jax.random.truncated_normal(
        kb, -2.0, 2.0, (out_features,), jnp.float32
    )
    return weight, bias


def confluence_ref(x, weight, bias):
    out = x @ weight + bias
    return (1.0 - 0.01) * jnp.clip(out, 0.0, 1.0) + 0.01 * out


if __name__ == "__main__":
    key = jax.random.PRNGKey(0)
    kx, kp = jax.random.split(key)

    # NOTE: at this toy size the kernel is launch-overhead dominated; it exists
    # to validate correctness. The tiling pays off at real (large) shapes.
    batch, in_features, out_features = 8, 32, 64
    x = jax.random.normal(kx, (batch, in_features), jnp.float32)
    weight, bias = init_params(kp, in_features, out_features)

    y = confluence_unit(x, weight, bias)
    y = jax.block_until_ready(y)

    y_ref = confluence_ref(x, weight, bias)
    assert y.shape == (batch, out_features)
    assert jnp.allclose(y, y_ref, atol=1e-5, rtol=1e-5)

    # Also exercise a shape that requires no padding and multiple grid steps.
    M2, K2, N2 = 1024, 256, 256
    k1, k2, k3 = jax.random.split(kx, 3)
    x2 = jax.random.normal(k1, (M2, K2), jnp.float32)
    w2 = jax.random.normal(k2, (K2, N2), jnp.float32) * 0.05
    b2 = jax.random.normal(k3, (N2,), jnp.float32) * 0.5
    y2 = jax.block_until_ready(confluence_unit(x2, w2, b2, tm=256, tn=128, tk=128))
    assert jnp.allclose(y2, confluence_ref(x2, w2, b2), atol=1e-4, rtol=1e-4)

    print("KERNEL_OK")
</pallas_src>

<mosaic_0001>
module attributes {stable_mosaic.version = 11 : i64} {
  func.func @confluence_kernel(%arg0: i32, %arg1: i32, %arg2: i32, %arg3: memref<8x128xf32, #tpu.memory_space<vmem>>, %arg4: memref<128x128xf32, #tpu.memory_space<vmem>>, %arg5: memref<1x128xf32, #tpu.memory_space<vmem>>, %arg6: memref<8x128xf32, #tpu.memory_space<vmem>>, %arg7: memref<8x128xf32, #tpu.memory_space<vmem>>) attributes {dimension_semantics = [#tpu.dimension_semantics<parallel>, #tpu.dimension_semantics<parallel>, #tpu.dimension_semantics<arbitrary>], iteration_bounds = array<i64: 1, 1, 1>, scalar_prefetch = 0 : i64, scratch_operands = 1 : i64, tpu.core_type = #tpu.core_type<tc>, window_params = [{transform_indices = @transform_0, window_bounds = array<i64: 8, 128>}, {transform_indices = @transform_1, window_bounds = array<i64: 128, 128>}, {transform_indices = @transform_2, window_bounds = array<i64: 1, 128>}, {transform_indices = @transform_3, window_bounds = array<i64: 8, 128>}]} {
    %c0_i32 = arith.constant 0 : i32
    %0 = arith.cmpi eq, %arg2, %c0_i32 : i32
    %1 = arith.extui %0 : i1 to i32
    %c0_i32_0 = arith.constant 0 : i32
    %2 = arith.cmpi ne, %1, %c0_i32_0 : i32
    scf.if %2 {
      %c0_10 = arith.constant 0 : index
      %c0_11 = arith.constant 0 : index
      %12 = vector.load %arg5[%c0_10, %c0_11] : memref<1x128xf32, #tpu.memory_space<vmem>>, vector<1x128xf32>
      %13 = vector.shape_cast %12 : vector<1x128xf32> to vector<1x128xf32>
      %14 = vector.broadcast %13 : vector<1x128xf32> to vector<8x128xf32>
      %c0_12 = arith.constant 0 : index
      %c0_13 = arith.constant 0 : index
      %15 = vector.load %arg7[%c0_12, %c0_13] : memref<8x128xf32, #tpu.memory_space<vmem>>, vector<8x128xf32>
      tpu.vector_store %arg7[%c0_12, %c0_13], %14 {strides = array<i32>} : memref<8x128xf32, #tpu.memory_space<vmem>>, vector<8x128xf32>,
    } else {
    }
    %c0 = arith.constant 0 : index
    %c0_1 = arith.constant 0 : index
    %3 = vector.load %arg7[%c0, %c0_1] : memref<8x128xf32, #tpu.memory_space<vmem>>, vector<8x128xf32>
    %c0_2 = arith.constant 0 : index
    %c0_3 = arith.constant 0 : index
    %4 = vector.load %arg3[%c0_2, %c0_3] : memref<8x128xf32, #tpu.memory_space<vmem>>, vector<8x128xf32>
    %c0_4 = arith.constant 0 : index
    %c0_5 = arith.constant 0 : index
    %5 = vector.load %arg4[%c0_4, %c0_5] : memref<128x128xf32, #tpu.memory_space<vmem>>, vector<128x128xf32>
    %cst = arith.constant dense<0.000000e+00> : vector<8x128xf32>
    %6 = tpu.matmul %4, %5, %cst {dimension_numbers = #tpu.dot_dimension_numbers<[1], [0], [0], [1], [0, 0, 1, 1], [], []>} : vector<8x128xf32>, vector<128x128xf32>, vector<8x128xf32> -> vector<8x128xf32>
    %7 = arith.addf %3, %6 : vector<8x128xf32>
    %c0_6 = arith.constant 0 : index
    %c0_7 = arith.constant 0 : index
    %8 = vector.load %arg7[%c0_6, %c0_7] : memref<8x128xf32, #tpu.memory_space<vmem>>, vector<8x128xf32>
    tpu.vector_store %arg7[%c0_6, %c0_7], %7 {strides = array<i32>} : memref<8x128xf32, #tpu.memory_space<vmem>>, vector<8x128xf32>,
    %c0_i32_8 = arith.constant 0 : i32
    %9 = arith.cmpi eq, %arg2, %c0_i32_8 : i32
    %10 = arith.extui %9 : i1 to i32
    %c0_i32_9 = arith.constant 0 : i32
    %11 = arith.cmpi ne, %10, %c0_i32_9 : i32
    scf.if %11 {
      %c0_10 = arith.constant 0 : index
      %c0_11 = arith.constant 0 : index
      %12 = vector.load %arg7[%c0_10, %c0_11] : memref<8x128xf32, #tpu.memory_space<vmem>>, vector<8x128xf32>
      %cst_12 = arith.constant 0.000000e+00 : f32
      %cst_13 = arith.constant 1.000000e+00 : f32
      %13 = vector.broadcast %cst_12 : f32 to vector<8x128xf32>
      %14 = arith.maximumf %13, %12 : vector<8x128xf32>
      %15 = vector.broadcast %cst_13 : f32 to vector<8x128xf32>
      %16 = arith.minimumf %15, %14 : vector<8x128xf32>
      %17 = arith.subf %12, %16 : vector<8x128xf32>
      %cst_14 = arith.constant 9.900000e-01 : f32
      %18 = vector.broadcast %cst_14 : f32 to vector<8x128xf32>
      %19 = arith.mulf %18, %17 : vector<8x128xf32>
      %20 = arith.subf %12, %19 : vector<8x128xf32>
      %c0_15 = arith.constant 0 : index
      %c0_16 = arith.constant 0 : index
      %21 = vector.load %arg6[%c0_15, %c0_16] : memref<8x128xf32, #tpu.memory_space<vmem>>, vector<8x128xf32>
      tpu.vector_store %arg6[%c0_15, %c0_16], %20 {strides = array<i32>} : memref<8x128xf32, #tpu.memory_space<vmem>>, vector<8x128xf32>,
    } else {
    }
    return
  }
  func.func @transform_0(%arg0: i32, %arg1: i32, %arg2: i32) -> (i32, i32) {
    %c0_i32 = arith.constant 0 : i32
    return %arg0, %arg2 : i32, i32
  }
  func.func @transform_1(%arg0: i32, %arg1: i32, %arg2: i32) -> (i32, i32) {
    %c0_i32 = arith.constant 0 : i32
    return %arg2, %arg1 : i32, i32
  }
  func.func @transform_2(%arg0: i32, %arg1: i32, %arg2: i32) -> (i32, i32) {
    %c0_i32 = arith.constant 0 : i32
    %c0_i32_0 = arith.constant 0 : i32
    return %c0_i32, %arg1 : i32, i32
  }
  func.func @transform_3(%arg0: i32, %arg1: i32, %arg2: i32) -> (i32, i32) {
    %c0_i32 = arith.constant 0 : i32
    return %arg0, %arg1 : i32, i32
  }
}

</mosaic_0001>

<bundles_post_ra>
// kernel: confluence_unit.1
= control target key start
LH: loop header
LB: loop body
LE: loop exit
PB: predicated region body
PF: predicated region fallthrough
CT: control target
= control target key end

     0   :  { %v219_v1 = vmov 0.0   ;;  %vm220_vm0 = vmmov 0   ;;  %s299_s0 = inlined_call_operand.vmem [shape: f32[8,128], index: 0, kind: input, shape index: {}]   ;;  %s300_s1 = inlined_call_operand.vmem [shape: f32[128,128], index: 1, kind: input, shape index: {}]   ;;  %s301_s2 = inlined_call_operand.vmem [shape: f32[1,128], index: 2, kind: input, shape index: {}]   ;;  %s302_s3 = inlined_call_operand.hbm [shape: f32[8,128], index: 3, kind: output, shape index: {}]  }
   0x1   :  { %v44_v0 = vld [vmem:[%s300_s1 + $0x78] sm:$0xff]  ;;  %159 = vmatprep.subr.mxu0 %v219_v1  ;;  %v43_v2 = vld [vmem:[%s300_s1 + $0x70] sm:$0xff]  ;;  %191 = vmatprep.mubr.msk.f32.mxu0 %vm220_vm0, %v219_v1  ;;  %v42_v3 = vld [vmem:[%s300_s1 + $0x68] sm:$0xff] }
   0x2   :  { %160 = vmatpush3.msra.mxu0 %v44_v0  ;;  %v41_v4 = vld [vmem:[%s300_s1 + $0x60] sm:$0xff] }
   0x3   :  { %161 = vmatprep.subr.mxu0 %v219_v1 }
   0x4   :  { %162 = vmatpush3.msra.mxu0 %v43_v2 }
   0x5   :  { %163 = vmatprep.subr.mxu0 %v219_v1 }
   0x6   :  { %164 = vmatpush3.msra.mxu0 %v42_v3 }
   0x7   :  { %8 = vsyncpa [#allocation4], 0  ;;  %165 = vmatprep.subr.mxu0 %v219_v1  ;;  %v40_v5 = vld [vmem:[%s300_s1 + $0x58] sm:$0xff]  ;;  %v39_v6 = vld [vmem:[%s300_s1 + $0x50] sm:$0xff]  ;;  %s221_s21 = smov [#allocation3]  }
   0x8   :  { %166 = vmatpush3.msra.mxu0 %v41_v4  ;;  %v38_v7 = vld [vmem:[%s300_s1 + $0x48] sm:$0xff]  ;;  %v37_v8 = vld [vmem:[%s300_s1 + $0x40] sm:$0xff]  ;;  %v36_v9 = vld [vmem:[%s300_s1 + $0x38] sm:$0xff] }
   0x9   :  { %167 = vmatprep.subr.mxu0 %v219_v1  ;;  %v35_v10 = vld [vmem:[%s300_s1 + $0x30] sm:$0xff]  ;;  %v34_v11 = vld [vmem:[%s300_s1 + $0x28] sm:$0xff]  ;;  %v33_v12 = vld [vmem:[%s300_s1 + $0x20] sm:$0xff] }
   0xa   :  { %168 = vmatpush3.msra.mxu0 %v40_v5  ;;  %v32_v13 = vld [vmem:[%s300_s1 + $0x18] sm:$0xff]  ;;  %v31_v14 = vld [vmem:[%s300_s1 + $0x10] sm:$0xff]  ;;  %v30_v15 = vld [vmem:[%s300_s1 + $0x8] sm:$0xff] }
   0xb   :  { %169 = vmatprep.subr.mxu0 %v219_v1  ;;  %v29_v16 = vld [vmem:[%s300_s1] sm:$0xff]  ;;  %s133_s1 = sshll.u32 %s221_s21, 4  ;;  %s134_s1 = int_to_ptr.vmem [resolvable:$true] %s133_s1 }
   0xc   :  { %170 = vmatpush3.msra.mxu0 %v39_v6  ;;  %v28_v17 = vld [vmem:[%s299_s0] sm:$0xff]  ;;  %s197_s0 = scalar_lea.vmem %s134_s1, 128  ;;  %p202_p1 = scmp.lt.s32.totalorder %s134_s1, %s134_s1 }
   0xd   :  { %171 = vmatprep.subr.mxu0 %v219_v1  ;;  %v141_v18 = vld [vmem:[%s301_s2] ss:$0 sm:$0xff]  ;;  %p198_p0 = scmp.ne.s32.totalorder %s134_s1, %s197_s0  ;;  %p203_p2 = scmp.lt.s32.totalorder %s197_s0, %s197_s0 }
   0xe   :  { %172 = vmatpush3.msra.mxu0 %v38_v7 }
   0xf   :  { %173 = vmatprep.subr.mxu0 %v219_v1  ;;  %p204_p3 = por %p203_p2, %p202_p1 }
  0x10   :  { %174 = vmatpush3.msra.mxu0 %v37_v8 }
  0x11   :  { %175 = vmatprep.subr.mxu0 %v219_v1  ;;  %p205_p4 = pnand %p204_p3, %p198_p0 }
  0x12   :  { %176 = vmatpush3.msra.mxu0 %v36_v9 }
  0x13   :  { %177 = vmatprep.subr.mxu0 %v219_v1 }
  0x14   :  { %178 = vmatpush3.msra.mxu0 %v35_v10 }
  0x15   :  { %179 = vmatprep.subr.mxu0 %v219_v1 }
  0x16   :  { %180 = vmatpush3.msra.mxu0 %v34_v11 }
  0x17   :  { %181 = vmatprep.subr.mxu0 %v219_v1 }
  0x18   :  { %182 = vmatpush3.msra.mxu0 %v33_v12 }
  0x19   :  { %183 = vmatprep.subr.mxu0 %v219_v1 }
  0x1a   :  { %184 = vmatpush3.msra.mxu0 %v32_v13 }
  0x1b   :  { %185 = vmatprep.subr.mxu0 %v219_v1 }
  0x1c   :  { %186 = vmatpush3.msra.mxu0 %v31_v14 }
  0x1d   :  { %187 = vmatprep.subr.mxu0 %v219_v1 }
  0x1e   :  { %188 = vmatpush3.msra.mxu0 %v30_v15 }
  0x1f   :  { %189 = vmatprep.subr.mxu0 %v219_v1 }
  0x20   :  { %190 = vmatpush3.msra.mxu0 %v29_v16 }
  0x21   :  { %192 = vmatmul.mubr.f32.vlgmr.msra.gmra.mxu0 %v28_v17 }
  0xe1   :  { %v111_v19 = vpop.f32.mrf.mxu0 }
  0xe2   :  { %v115_v20 = vadd.f32 %v141_v18, %v111_v19 }
  0xe3   :  { %v193_v21 = vpop.f32.mrf.mxu0 }
  0xe4   :  { %v121_v22 = vmax.f32 %v115_v20, 0.0 }
  0xe6   :  { %v122_v23 = vmin.f32 %v121_v22, 1.0 }
  0xe8   :  { %v123_v24 = vsub.f32 %v115_v20, %v122_v23 }
  0xea   :  { %v124_v25 = vmul.f32 0.99, %v123_v24 }
  0xec   :  { %v125_v26 = vsub.f32 %v115_v20, %v124_v25 }
  0xee   :  { %126 = vst [vmem:[#allocation3] sm:$0xff] %v125_v26 }
  0xef   :  { %208 = shalt.err (!%p205_p4)
}
  0xf0   :  { %136 = dma.vmem_to_hbm [thread:$0]  %s134_s1, 128, %s302_s3, [#allocation4]  }
  0xf1   :  { %217 = dma.done.wait [#allocation4], 128  }
  0xf2   :  { %218 = vsyncadd [#allocation4], 4294967168 }
  0xf3   :  { %140 = vsyncpa [#allocation4], 1 }

</bundles_post_ra>
